<compile_context>
chip_gen: v5e
topology: v5e:2x2
jax: 0.10.0
libtpu: 0.0.40
codegen_flags: <defaults>
</compile_context>

<pallas_src>
import jax
import jax.numpy as jnp
from jax.experimental import pallas as pl
from jax.experimental.pallas import tpu as pltpu


H, W = 12, 14          # input spatial dims
NPIX = H * W           # 168 conv1 output positions
NC_IN = 256            # input channels
NOUT = 9               # 3x3 final output pixels
OUT_LANES = 16         # lane-major output width (first 9 lanes valid)
MB_ROWS = 176          # 168 rows of M + 1 bias row + 7 pad rows (multiple of 8)


# ------------------------------ fused kernel ------------------------------- #

def _fused_kernel(x_ref, w1_ref, mb_ref, o_ref):
    f32 = jnp.float32
    # conv1 (1x1, 256->1) at every pixel: one K=256 GEMM.  w1 is padded to 8
    # sublanes (rows 1..7 are zero) so the MXU sees an aligned LHS.
    t1 = jnp.dot(w1_ref[...], x_ref[...], preferred_element_type=f32)       # (8, 168)
    # conv2..conv7 folded into a single (168,16) affine map.
    out = jnp.dot(t1, mb_ref[0:NPIX, :], preferred_element_type=f32)        # (8, 16)
    o_ref[...] = out + mb_ref[NPIX:NPIX + 1, :]                             # + bias row


# ------------------------------ wrapper glue ------------------------------- #

def fused_forward(x, p):
    # Free reshape: X[c, h*14 + w] = x[0, c, h, w].  No wrapper-side compute.
    xmat = x.reshape(NC_IN, NPIX)
    out = pl.pallas_call(
        _fused_kernel,
        out_shape=jax.ShapeDtypeStruct((8, OUT_LANES), jnp.float32),
        grid=(1,),
        in_specs=[
            pl.BlockSpec((NC_IN, NPIX), lambda i: (0, 0)),
            pl.BlockSpec((8, NC_IN), lambda i: (0, 0)),
            pl.BlockSpec((MB_ROWS, OUT_LANES), lambda i: (0, 0)),
        ],
        out_specs=pl.BlockSpec((8, OUT_LANES), lambda i: (0, 0)),
        compiler_params=pltpu.CompilerParams(dimension_semantics=("arbitrary",)),
    )(xmat, p["w1"], p["mb"])
    return out[0, :NOUT].reshape(1, 1, 3, 3)


# --------------------------- parameter creation ----------------------------- #

def _init_conv(key, cout, cin, kh, kw):
    kw_key, kb_key = jax.random.split(key)
    fan_in = cin * kh * kw
    bound = 1.0 / jnp.sqrt(fan_in)
    w = jax.random.uniform(kw_key, (cout, cin, kh, kw), jnp.float32, -bound, bound)
    b = jax.random.uniform(kb_key, (cout,), jnp.float32, -bound, bound)
    return w, b


def make_params(key):
    """PyTorch-layout parameters (OIHW weights; ConvTranspose2d is (Cin,Cout,kh,kw))."""
    ks = jax.random.split(key, 7)
    params = {
        "conv1": _init_conv(ks[0], 1, 256, 1, 1),
        "conv2": _init_conv(ks[1], 3, 1, 4, 4),
        "conv3": _init_conv(ks[2], 32, 3, 1, 1),
        "conv4": _init_conv(ks[3], 51, 32, 5, 5),
        "conv5": _init_conv(ks[4], 1, 51, 1, 1),
        "conv6": _init_conv(ks[5], 4, 1, 1, 1),
    }
    wt_key, bt_key = jax.random.split(ks[6])
    bound = 1.0 / jnp.sqrt(4.0)
    w7 = jax.random.uniform(wt_key, (4, 1, 1, 1), jnp.float32, -bound, bound)
    b7 = jax.random.uniform(bt_key, (1,), jnp.float32, -bound, bound)
    params["conv7"] = (w7, b7)
    return params


def prepare_params(params):
    """One-time algebraic fold of conv2..conv7 into a single (168,16) affine map.

    Exact refactoring in f32 (no nonlinearities anywhere in the chain):
      v7[p] = sum_{h,w} conv1_nobias(x)[h,w] * M[h*14+w, p] + bias[p]
    """
    w1, b1 = params["conv1"]   # (1,256,1,1), (1,)
    w2, b2 = params["conv2"]   # (3,1,4,4),  (3,)
    w3, b3 = params["conv3"]   # (32,3,1,1), (32,)
    w4, b4 = params["conv4"]   # (51,32,5,5),(51,)
    w5, b5 = params["conv5"]   # (1,51,1,1), (1,)
    w6, b6 = params["conv6"]   # (4,1,1,1),  (4,)
    w7, b7 = params["conv7"]   # (4,1,1,1),  (1,)   ConvTranspose2d: (Cin,Cout,kh,kw)
    f32 = jnp.float32

    # conv1 weight, padded to 8 MXU rows (row 0 is the real filter, rest zero).
    w1_pad = jnp.zeros((8, NC_IN), f32).at[0].set(w1.reshape(NC_IN))

    # ---- conv2 . conv3 fold: W23[ki,kj,o3]; bias reaching conv3's output.
    w2f = w2.reshape(3, 4, 4)                                   # (o2, ki, kj)
    w3f = w3.reshape(32, 3)                                     # (o3, o2)
    W23 = jnp.einsum("oij,po->ijp", w2f, w3f)                   # (4,4,32)
    s2 = w2f.sum(axis=(1, 2))                                   # (3,)  sum of conv2 taps (carries b1)
    b3f = w3f @ (b1[0] * s2 + b2) + b3                          # (32,)

    # ---- conv5 . conv6 . conv7 fold: 51 -> 1 affine.
    a = jnp.sum(w6.reshape(4) * w7.reshape(4))
    w567 = a * w5.reshape(51)                                   # (51,)
    b567 = a * b5[0] + jnp.sum(b6 * w7.reshape(4)) + b7[0]

    # ---- conv4 folded with conv5..7: W4567[ki,kj,o3]; its bias term.
    W4567 = jnp.einsum("aoij,a->ijo", w4, w567)                 # (5,5,32)
    b4567 = jnp.dot(b4, w567) + b567

    # ---- conv4 is 5x5/pad-2 on a 3x3 grid, so every (out,in) pixel pair is in
    # range: tap offset = q - p + 2 for q,p in 0..2 (no padded-zero bookkeeping).
    idx = jnp.arange(3)
    d = idx[:, None] - idx[None, :] + 2                         # d[q, p]
    W4q = W4567[d[:, :, None, None], d[None, None, :, :], :]    # (qh,ph,qw,pw,32)

    # coeff[qh,qw,ki,kj,ph,pw] multiplies conv1's (bias-free) output at (4qh+ki, 4qw+kj).
    coeff = jnp.einsum("ijo,apbqo->abijpq", W23, W4q)           # (3,3,4,4,3,3)
    mgrid = coeff.transpose(0, 2, 1, 3, 4, 5).reshape(12, 12, NOUT)

    m168 = jnp.zeros((H, W, OUT_LANES), f32).at[:, :12, :NOUT].set(mgrid)
    m168 = m168.reshape(NPIX, OUT_LANES)                        # (168, 16)

    bias = jnp.einsum("o,apbqo->pq", b3f, W4q).reshape(NOUT) + b4567
    bias_row = jnp.zeros((1, OUT_LANES), f32).at[0, :NOUT].set(bias)

    # Pack M + bias into one (8,128)-friendly slab -> a single small DMA.
    mb = jnp.concatenate(
        [m168, bias_row, jnp.zeros((MB_ROWS - NPIX - 1, OUT_LANES), f32)], axis=0)
    return {"w1": w1_pad, "mb": mb}


# ------------------------- pure-JAX reference check ------------------------- #

def _ref_forward(x, params):
    def conv(x, w, b, stride=1, padding=0):
        y = jax.lax.conv_general_dilated(
            x, w, window_strides=(stride, stride),
            padding=((padding, padding), (padding, padding)),
            dimension_numbers=("NCHW", "OIHW", "NCHW"))
        return y + b.reshape(1, -1, 1, 1)

    v = conv(x, *params["conv1"])
    v = conv(v, *params["conv2"], stride=4)
    v = conv(v, *params["conv3"])
    v = conv(v, *params["conv4"], padding=2)
    v = conv(v, *params["conv5"])
    v = conv(v, *params["conv6"])
    w7, b7 = params["conv7"]       # 1x1 stride-1 transpose conv == 1x1 conv w/ swapped io
    v = conv(v, w7.transpose(1, 0, 2, 3), b7)
    return v


# ----------------------------------- main ----------------------------------- #

if __name__ == "__main__":
    key = jax.random.PRNGKey(0)
    kx, kp = jax.random.split(key)
    x1 = jax.random.normal(kx, (1, 256, 12, 14), jnp.float32)

    raw_params = make_params(kp)
    params = prepare_params(raw_params)

    out = jax.jit(fused_forward)(x1, params)
    out = jax.block_until_ready(out)

    assert out.shape == (1, 1, 3, 3), out.shape
    assert out.dtype == jnp.float32
    assert bool(jnp.all(jnp.isfinite(out)))

    ref = _ref_forward(x1, raw_params)
    assert bool(jnp.allclose(out, ref, rtol=5e-2, atol=5e-2)), (out, ref)

    print("KERNEL_OK")
</pallas_src>

<mosaic_0001>
module attributes {stable_mosaic.version = 11 : i64} {
  func.func @_fused_kernel(%arg0: i32, %arg1: memref<256x168xf32, #tpu.memory_space<vmem>>, %arg2: memref<8x256xf32, #tpu.memory_space<vmem>>, %arg3: memref<176x16xf32, #tpu.memory_space<vmem>>, %arg4: memref<8x16xf32, #tpu.memory_space<vmem>>) attributes {dimension_semantics = [#tpu.dimension_semantics<arbitrary>], iteration_bounds = array<i64: 1>, scalar_prefetch = 0 : i64, scratch_operands = 0 : i64, tpu.core_type = #tpu.core_type<tc>, window_params = [{pipeline_mode = #tpu.pipeline_mode<synchronous>, transform_indices = @transform_0, window_bounds = array<i64: 256, 168>}, {pipeline_mode = #tpu.pipeline_mode<synchronous>, transform_indices = @transform_1, window_bounds = array<i64: 8, 256>}, {pipeline_mode = #tpu.pipeline_mode<synchronous>, transform_indices = @transform_2, window_bounds = array<i64: 176, 16>}, {pipeline_mode = #tpu.pipeline_mode<synchronous>, transform_indices = @transform_3, window_bounds = array<i64: 8, 16>}]} {
    %c0 = arith.constant 0 : index
    %c0_0 = arith.constant 0 : index
    %0 = vector.load %arg2[%c0, %c0_0] : memref<8x256xf32, #tpu.memory_space<vmem>>, vector<8x256xf32>
    %c0_1 = arith.constant 0 : index
    %c0_2 = arith.constant 0 : index
    %1 = vector.load %arg1[%c0_1, %c0_2] : memref<256x168xf32, #tpu.memory_space<vmem>>, vector<256x168xf32>
    %cst = arith.constant dense<0.000000e+00> : vector<8x168xf32>
    %2 = tpu.matmul %0, %1, %cst {dimension_numbers = #tpu.dot_dimension_numbers<[1], [0], [0], [1], [0, 0, 1, 1], [], []>} : vector<8x256xf32>, vector<256x168xf32>, vector<8x168xf32> -> vector<8x168xf32>
    %c0_3 = arith.constant 0 : index
    %c0_4 = arith.constant 0 : index
    %3 = vector.load %arg3[%c0_3, %c0_4] : memref<176x16xf32, #tpu.memory_space<vmem>>, vector<168x16xf32>
    %cst_5 = arith.constant dense<0.000000e+00> : vector<8x16xf32>
    %4 = tpu.matmul %2, %3, %cst_5 {dimension_numbers = #tpu.dot_dimension_numbers<[1], [0], [0], [1], [0, 0, 1, 1], [], []>} : vector<8x168xf32>, vector<168x16xf32>, vector<8x16xf32> -> vector<8x16xf32>
    %c168 = arith.constant 168 : index
    %c0_6 = arith.constant 0 : index
    %5 = vector.load %arg3[%c168, %c0_6] : memref<176x16xf32, #tpu.memory_space<vmem>>, vector<1x16xf32>
    %6 = vector.broadcast %5 : vector<1x16xf32> to vector<8x16xf32>
    %7 = arith.addf %4, %6 : vector<8x16xf32>
    %c0_7 = arith.constant 0 : index
    %c0_8 = arith.constant 0 : index
    %8 = vector.load %arg4[%c0_7, %c0_8] : memref<8x16xf32, #tpu.memory_space<vmem>>, vector<8x16xf32>
    tpu.vector_store %arg4[%c0_7, %c0_8], %7 {strides = array<i32>} : memref<8x16xf32, #tpu.memory_space<vmem>>, vector<8x16xf32>,
    return
  }
  func.func @transform_0(%arg0: i32) -> (i32, i32) {
    %c0_i32 = arith.constant 0 : i32
    %c0_i32_0 = arith.constant 0 : i32
    %c0_i32_1 = arith.constant 0 : i32
    return %c0_i32, %c0_i32_0 : i32, i32
  }
  func.func @transform_1(%arg0: i32) -> (i32, i32) {
    %c0_i32 = arith.constant 0 : i32
    %c0_i32_0 = arith.constant 0 : i32
    %c0_i32_1 = arith.constant 0 : i32
    return %c0_i32, %c0_i32_0 : i32, i32
  }
  func.func @transform_2(%arg0: i32) -> (i32, i32) {
    %c0_i32 = arith.constant 0 : i32
    %c0_i32_0 = arith.constant 0 : i32
    %c0_i32_1 = arith.constant 0 : i32
    return %c0_i32, %c0_i32_0 : i32, i32
  }
  func.func @transform_3(%arg0: i32) -> (i32, i32) {
    %c0_i32 = arith.constant 0 : i32
    %c0_i32_0 = arith.constant 0 : i32
    %c0_i32_1 = arith.constant 0 : i32
    return %c0_i32, %c0_i32_0 : i32, i32
  }
}

</mosaic_0001>

<bundles_post_ra>
// kernel: squeeze.0
= control target key start
LH: loop header
LB: loop body
LE: loop exit
PB: predicated region body
PF: predicated region fallthrough
CT: control target
= control target key end

     0   :  { %s100_s0 = inlined_call_operand.vmem [shape: f32[9], index: 0, kind: input, shape index: {}]   ;;  %s101_s1 = inlined_call_operand.hbm [shape: f32[1,1,3,3], index: 1, kind: output, shape index: {}]  }
   0x1   :  { %v5_v0 = vld [vmem:[%s100_s0] sm:$0x1] }
   0x2   :  { %6 = vst [vmem:[#allocation3] sm:$0x1] %v5_v0 }
   0x3   :  { %2 = vsyncpa [#allocation1], 0  ;;  %s81_s0 = smov 125   ;;  %s82_s8 = smov 122   ;;  %vm8_vm0 = vcmask 23552  }
   0x4   :  { %s83_s9 = smov [#allocation0]   ;;  %s45_s1 = sshll.u32 %s101_s1, 4  ;;  %s46_s1 = int_to_ptr.hbm [resolvable:$true] %s45_s1 }
   0x5   :  { %s43_s10 = sshll.u32 %s83_s9, 4  ;;  %s44_s10 = int_to_ptr.vmem [resolvable:$true] %s43_s10 }
   0x9   :  { %v10_v1 = vld [vmem:[#allocation3] sm:$0x1]  }
   0xa   :  { %11 = vrot.lane.b32.xlu0 %v10_v1, %s81_s0  ;;  %v16_v2 = vld [vmem:[#allocation3] sm:$0x1]  }
   0xb   :  { %v7_v3 = vld [vmem:[#allocation3] sm:$0x1]  }
   0xc   :  { %9 = vst.msk [vmem:[#allocation2] sm:$0x1] %vm8_vm0, %v7_v3  }
  0x12   :  { %17 = vrot.lane.b32.xlu0 %v16_v2, %s82_s8 }
  0x13   :  { %v24_v4 = vld [vmem:[#allocation2] sm:$0x1] }
  0x14   :  { %27 = vst [vmem:[#allocation0] sm:$0x1] %v24_v4 }
  0x7c   :  { %v12_v5 = vpop.permute.xlu0 %11  }
  0x7d   :  { %15 = vst.msk [vmem:[#allocation2 + $0x8] sm:$0x1] %vm8_vm0, %v12_v5  }
  0x84   :  { %v29_v6 = vld [vmem:[#allocation2 + $0x8] sm:$0x1]  ;;  %v18_v7 = vpop.permute.xlu0 %17  }
  0x85   :  { %33 = vst [vmem:[#allocation0 + $0x1] sm:$0x1] %v29_v6 }
  0x86   :  { %21 = vst.msk [vmem:[#allocation2 + $0x10] sm:$0x1] %vm8_vm0, %v18_v7  }
  0x8d   :  { %v35_v8 = vld [vmem:[#allocation2 + $0x10] sm:$0x1] }
  0x8e   :  { %39 = vst [vmem:[#allocation0 + $0x2] sm:$0x1] %v35_v8 }
  0x8f   :  { %48 = dma.vmem_to_hbm [thread:$0]  %s44_s10, 48, %s46_s1, [#allocation1]  }
  0x90   :  { %79 = dma.done.wait [#allocation1], 48  }
  0x91   :  { %80 = vsyncadd [#allocation1], 4294967248 }
  0x92   :  { %51 = vsyncpa [#allocation1], 1 }

// kernel: fused_forward.1
= control target key start
LH: loop header
LB: loop body
LE: loop exit
PB: predicated region body
PF: predicated region fallthrough
CT: control target
= control target key end

     0   :  { %vm183_vm0 = vcmask 326656   ;;  %vm227_vm1 = vcmask 130048   ;;  %s522_s0 = inlined_call_operand.vmem [shape: f32[256,168], index: 0, kind: input, shape index: {}]   ;;  %s523_s2 = inlined_call_operand.vmem [shape: f32[176,16], index: 2, kind: input, shape index: {}]   ;;  %s524_s1 = inlined_call_operand.vmem [shape: f32[8,256], index: 1, kind: input, shape index: {}]   ;;  %s525_s3 = inlined_call_operand.vmem [shape: f32[8,16], index: 3, kind: output, shape index: {}]  }
   0x1   :  { %v47_v0 = vld [vmem:[%s522_s0 + $0xf8] sm:$0xff]  ;;  %v45_v2 = vld [vmem:[%s522_s0 + $0xe8] sm:$0xff]  ;;  %v46_v4 = vld [vmem:[%s522_s0 + $0xf0] sm:$0xff] }
   0x2   :  { %v79_v1 = vld [vmem:[%s522_s0 + $0x1f8] sm:$0xff]  ;;  %120 = vmatpush.msra.mxu2 %v47_v0  ;;  %v77_v3 = vld [vmem:[%s522_s0 + $0x1e8] sm:$0xff]  ;;  %v78_v5 = vld [vmem:[%s522_s0 + $0x1f0] sm:$0xff]  ;;  %80 = vmatpush.msra.mxu0 %v46_v4 }
   0x3   :  { %140 = vmatpush.msra.mxu3 %v79_v1  ;;  %100 = vmatpush.msra.mxu1 %v78_v5  ;;  %v43_v6 = vld [vmem:[%s522_s0 + $0xd8] sm:$0xff]  ;;  %v44_v8 = vld [vmem:[%s522_s0 + $0xe0] sm:$0xff]  ;;  %v41_v10 = vld [vmem:[%s522_s0 + $0xc8] sm:$0xff] }
   0x4   :  { %v75_v7 = vld [vmem:[%s522_s0 + $0x1d8] sm:$0xff]  ;;  %121 = vmatpush.msra.mxu2 %v45_v2  ;;  %v76_v9 = vld [vmem:[%s522_s0 + $0x1e0] sm:$0xff]  ;;  %81 = vmatpush.msra.mxu0 %v44_v8  ;;  %v73_v11 = vld [vmem:[%s522_s0 + $0x1c8] sm:$0xff] }
   0x5   :  { %141 = vmatpush.msra.mxu3 %v77_v3  ;;  %101 = vmatpush.msra.mxu1 %v76_v9  ;;  %v42_v12 = vld [vmem:[%s522_s0 + $0xd0] sm:$0xff]  ;;  %v40_v14 = vld [vmem:[%s522_s0 + $0xc0] sm:$0xff]  ;;  %v39_v16 = vld [vmem:[%s522_s0 + $0xb8] sm:$0xff] }
   0x6   :  { %v74_v13 = vld [vmem:[%s522_s0 + $0x1d0] sm:$0xff]  ;;  %122 = vmatpush.msra.mxu2 %v43_v6  ;;  %v72_v15 = vld [vmem:[%s522_s0 + $0x1c0] sm:$0xff]  ;;  %82 = vmatpush.msra.mxu0 %v42_v12  ;;  %v71_v17 = vld [vmem:[%s522_s0 + $0x1b8] sm:$0xff] }
   0x7   :  { %142 = vmatpush.msra.mxu3 %v75_v7  ;;  %102 = vmatpush.msra.mxu1 %v74_v13  ;;  %v38_v18 = vld [vmem:[%s522_s0 + $0xb0] sm:$0xff]  ;;  %v37_v20 = vld [vmem:[%s522_s0 + $0xa8] sm:$0xff]  ;;  %v36_v22 = vld [vmem:[%s522_s0 + $0xa0] sm:$0xff] }
   0x8   :  { %123 = vmatpush.msra.mxu2 %v41_v10  ;;  %v70_v19 = vld [vmem:[%s522_s0 + $0x1b0] sm:$0xff]  ;;  %83 = vmatpush.msra.mxu0 %v40_v14  ;;  %v69_v21 = vld [vmem:[%s522_s0 + $0x1a8] sm:$0xff]  ;;  %v68_v23 = vld [vmem:[%s522_s0 + $0x1a0] sm:$0xff] }
   0x9   :  { %143 = vmatpush.msra.mxu3 %v73_v11  ;;  %103 = vmatpush.msra.mxu1 %v72_v15  ;;  %v35_v24 = vld [vmem:[%s522_s0 + $0x98] sm:$0xff]  ;;  %v34_v26 = vld [vmem:[%s522_s0 + $0x90] sm:$0xff]  ;;  %v33_v28 = vld [vmem:[%s522_s0 + $0x88] sm:$0xff] }
   0xa   :  { %124 = vmatpush.msra.mxu2 %v39_v16  ;;  %84 = vmatpush.msra.mxu0 %v38_v18  ;;  %v67_v25 = vld [vmem:[%s522_s0 + $0x198] sm:$0xff]  ;;  %v66_v27 = vld [vmem:[%s522_s0 + $0x190] sm:$0xff]  ;;  %v65_v29 = vld [vmem:[%s522_s0 + $0x188] sm:$0xff] }
   0xb   :  { %144 = vmatpush.msra.mxu3 %v71_v17  ;;  %104 = vmatpush.msra.mxu1 %v70_v19  ;;  %v32_v30 = vld [vmem:[%s522_s0 + $0x80] sm:$0xff]  ;;  %v31_v32 = vld [vmem:[%s522_s0 + $0x78] sm:$0xff]  ;;  %v30_v34 = vld [vmem:[%s522_s0 + $0x70] sm:$0xff] }
   0xc   :  { %125 = vmatpush.msra.mxu2 %v37_v20  ;;  %85 = vmatpush.msra.mxu0 %v36_v22  ;;  %v64_v31 = vld [vmem:[%s522_s0 + $0x180] sm:$0xff]  ;;  %v63_v33 = vld [vmem:[%s522_s0 + $0x178] sm:$0xff]  ;;  %v62_v35 = vld [vmem:[%s522_s0 + $0x170] sm:$0xff] }
   0xd   :  { %145 = vmatpush.msra.mxu3 %v69_v21  ;;  %105 = vmatpush.msra.mxu1 %v68_v23  ;;  %v29_v36 = vld [vmem:[%s522_s0 + $0x68] sm:$0xff]  ;;  %v28_v38 = vld [vmem:[%s522_s0 + $0x60] sm:$0xff]  ;;  %v27_v40 = vld [vmem:[%s522_s0 + $0x58] sm:$0xff] }
   0xe   :  { %126 = vmatpush.msra.mxu2 %v35_v24  ;;  %86 = vmatpush.msra.mxu0 %v34_v26  ;;  %v61_v37 = vld [vmem:[%s522_s0 + $0x168] sm:$0xff]  ;;  %v60_v39 = vld [vmem:[%s522_s0 + $0x160] sm:$0xff]  ;;  %v59_v41 = vld [vmem:[%s522_s0 + $0x158] sm:$0xff] }
   0xf   :  { %146 = vmatpush.msra.mxu3 %v67_v25  ;;  %106 = vmatpush.msra.mxu1 %v66_v27  ;;  %v26_v42 = vld [vmem:[%s522_s0 + $0x50] sm:$0xff]  ;;  %v25_v44 = vld [vmem:[%s522_s0 + $0x48] sm:$0xff]  ;;  %v24_v46 = vld [vmem:[%s522_s0 + $0x40] sm:$0xff] }
  0x10   :  { %127 = vmatpush.msra.mxu2 %v33_v28  ;;  %87 = vmatpush.msra.mxu0 %v32_v30  ;;  %v58_v43 = vld [vmem:[%s522_s0 + $0x150] sm:$0xff]  ;;  %v57_v45 = vld [vmem:[%s522_s0 + $0x148] sm:$0xff]  ;;  %v56_v47 = vld [vmem:[%s522_s0 + $0x140] sm:$0xff] }
  0x11   :  { %147 = vmatpush.msra.mxu3 %v65_v29  ;;  %107 = vmatpush.msra.mxu1 %v64_v31  ;;  %v23_v48 = vld [vmem:[%s522_s0 + $0x38] sm:$0xff]  ;;  %v22_v50 = vld [vmem:[%s522_s0 + $0x30] sm:$0xff]  ;;  %v21_v52 = vld [vmem:[%s522_s0 + $0x28] sm:$0xff] }
  0x12   :  { %128 = vmatpush.msra.mxu2 %v31_v32  ;;  %88 = vmatpush.msra.mxu0 %v30_v34  ;;  %v55_v49 = vld [vmem:[%s522_s0 + $0x138] sm:$0xff]  ;;  %v54_v51 = vld [vmem:[%s522_s0 + $0x130] sm:$0xff]  ;;  %v53_v53 = vld [vmem:[%s522_s0 + $0x128] sm:$0xff] }
  0x13   :  { %148 = vmatpush.msra.mxu3 %v63_v33  ;;  %108 = vmatpush.msra.mxu1 %v62_v35  ;;  %v20_v54 = vld [vmem:[%s522_s0 + $0x20] sm:$0xff]  ;;  %v19_v56 = vld [vmem:[%s522_s0 + $0x18] sm:$0xff]  ;;  %v18_v58 = vld [vmem:[%s522_s0 + $0x10] sm:$0xff] }
  0x14   :  { %129 = vmatpush.msra.mxu2 %v29_v36  ;;  %89 = vmatpush.msra.mxu0 %v28_v38  ;;  %v52_v55 = vld [vmem:[%s522_s0 + $0x120] sm:$0xff]  ;;  %v51_v57 = vld [vmem:[%s522_s0 + $0x118] sm:$0xff]  ;;  %v50_v59 = vld [vmem:[%s522_s0 + $0x110] sm:$0xff] }
  0x15   :  { %149 = vmatpush.msra.mxu3 %v61_v37  ;;  %109 = vmatpush.msra.mxu1 %v60_v39  ;;  %v17_v60 = vld [vmem:[%s522_s0 + $0x8] sm:$0xff]  ;;  %v14_v62 = vld [vmem:[%s524_s1] sm:$0xff]  ;;  %v175_v2 = vld [vmem:[%s523_s2 + $0x78] sm:$0xff] }
  0x16   :  { %130 = vmatpush.msra.mxu2 %v27_v40  ;;  %90 = vmatpush.msra.mxu0 %v26_v42  ;;  %v49_v61 = vld [vmem:[%s522_s0 + $0x108] sm:$0xff]  ;;  %v16_v0 = vld [vmem:[%s522_s0] sm:$0xff]  ;;  %v174_v4 = vld [vmem:[%s523_s2 + $0x70] sm:$0xff] }
  0x17   :  { %150 = vmatpush.msra.mxu3 %v59_v41  ;;  %110 = vmatpush.msra.mxu1 %v58_v43  ;;  %v15_v63 = vld [vmem:[%s524_s1 + $0x8] sm:$0xff]  ;;  %v48_v1 = vld [vmem:[%s522_s0 + $0x100] sm:$0xff]  ;;  %v179_v5 = vld [vmem:[%s523_s2 + $0x98] sm:$0xff] }
  0x18   :  { %131 = vmatpush.msra.mxu2 %v25_v44  ;;  %91 = vmatpush.msra.mxu0 %v24_v46  ;;  %v180_v3 = vld [vmem:[%s523_s2 + $0xa0] sm:$0xff]  ;;  %v173_v6 = vld [vmem:[%s523_s2 + $0x68] sm:$0xff]  ;;  %v171_v8 = vld [vmem:[%s523_s2 + $0x58] sm:$0xff] }
  0x19   :  { %151 = vmatpush.msra.mxu3 %v57_v45  ;;  %111 = vmatpush.msra.mxu1 %v56_v47  ;;  %v172_v7 = vld [vmem:[%s523_s2 + $0x60] sm:$0xff]  ;;  %v170_v9 = vld [vmem:[%s523_s2 + $0x50] sm:$0xff]  ;;  %v169_v10 = vld [vmem:[%s523_s2 + $0x48] sm:$0xff] }
  0x1a   :  { %132 = vmatpush.msra.mxu2 %v23_v48  ;;  %92 = vmatpush.msra.mxu0 %v22_v50  ;;  %v168_v11 = vld [vmem:[%s523_s2 + $0x40] sm:$0xff]  ;;  %v167_v12 = vld [vmem:[%s523_s2 + $0x38] sm:$0xff]  ;;  %v166_v13 = vld [vmem:[%s523_s2 + $0x30] sm:$0xff] }
  0x1b   :  { %152 = vmatpush.msra.mxu3 %v55_v49  ;;  %112 = vmatpush.msra.mxu1 %v54_v51  ;;  %v165_v14 = vld [vmem:[%s523_s2 + $0x28] sm:$0xff]  ;;  %v164_v15 = vld [vmem:[%s523_s2 + $0x20] sm:$0xff]  ;;  %v163_v16 = vld [vmem:[%s523_s2 + $0x18] sm:$0xff] }
  0x1c   :  { %133 = vmatpush.msra.mxu2 %v21_v52  ;;  %93 = vmatpush.msra.mxu0 %v20_v54  ;;  %v162_v17 = vld [vmem:[%s523_s2 + $0x10] sm:$0xff]  ;;  %v161_v18 = vld [vmem:[%s523_s2 + $0x8] sm:$0xff]  ;;  %v160_v20 = vld [vmem:[%s523_s2] sm:$0xff] }
  0x1d   :  { %153 = vmatpush.msra.mxu3 %v53_v53  ;;  %113 = vmatpush.msra.mxu1 %v52_v55  ;;  %v178_v19 = vld [vmem:[%s523_s2 + $0x90] sm:$0xff]  ;;  %v177_v21 = vld [vmem:[%s523_s2 + $0x88] sm:$0xff]  ;;  %v176_v22 = vld [vmem:[%s523_s2 + $0x80] sm:$0xff] }
  0x1e   :  { %134 = vmatpush.msra.mxu2 %v19_v56  ;;  %94 = vmatpush.msra.mxu0 %v18_v58  ;;  %v234_v29 = vld [vmem:[%s523_s2 + $0xa8] ss:$0 sm:$0xff] }
  0x1f   :  { %154 = vmatpush.msra.mxu3 %v51_v57  ;;  %114 = vmatpush.msra.mxu1 %v50_v59 }
  0x20   :  { %135 = vmatpush.msra.mxu2 %v17_v60  ;;  %95 = vmatpush.msra.mxu0 %v16_v0 }
  0x21   :  { %155 = vmatpush.msra.mxu3 %v49_v61  ;;  %136 = vmatmul.f32.vlgmr.msra.gmra.mxu2 %v14_v62 }
  0x22   :  { %156 = vmatmul.f32.vlgmr.msra.gmra.mxu3 %v15_v63  ;;  %115 = vmatpush.msra.mxu1 %v48_v1 }
  0x23   :  { %96 = vmatmul.f32.vlgmr.msra.gmra.mxu0 %v14_v62  ;;  %116 = vmatmul.f32.vlgmr.msra.gmra.mxu1 %v15_v63 }
  0x24   :  { %187 = vmatpush.msrb.mxu0 %v175_v2  ;;  %218 = vmatpush.msrb.mxu1 %v180_v3 }
  0x26   :  { %188 = vmatpush.msrb.mxu0 %v174_v4  ;;  %219 = vmatpush.msrb.mxu1 %v179_v5 }
  0x28   :  { %189 = vmatpush.msrb.mxu0 %v173_v6  ;;  %220 = vmatpush.msrb.mxu1 %v178_v19 }
  0x2a   :  { %190 = vmatpush.msrb.mxu0 %v172_v7  ;;  %221 = vmatpush.msrb.mxu1 %v177_v21 }
  0x2c   :  { %191 = vmatpush.msrb.mxu0 %v171_v8  ;;  %222 = vmatpush.msrb.mxu1 %v176_v22 }
  0x2e   :  { %192 = vmatpush.msrb.mxu0 %v170_v9 }
  0x30   :  { %193 = vmatpush.msrb.mxu0 %v169_v10 }
  0x32   :  { %194 = vmatpush.msrb.mxu0 %v168_v11 }
  0x34   :  { %195 = vmatpush.msrb.mxu0 %v167_v12 }
  0x36   :  { %196 = vmatpush.msrb.mxu0 %v166_v13 }
  0x38   :  { %197 = vmatpush.msrb.mxu0 %v165_v14 }
  0x3a   :  { %198 = vmatpush.msrb.mxu0 %v164_v15 }
  0x3c   :  { %199 = vmatpush.msrb.mxu0 %v163_v16 }
  0x3e   :  { %200 = vmatpush.msrb.mxu0 %v162_v17 }
  0x40   :  { %201 = vmatpush.msrb.mxu0 %v161_v18 }
  0x42   :  { %202 = vmatpush.msrb.mxu0 %v160_v20 }
  0xa0   :  { %v97_v23 = vpop.f32.mrf.mxu0  ;;  %v117_v24 = vpop.f32.mrf.mxu1 }
  0xa1   :  { %v118_v25 = vadd.f32 %v117_v24, %v97_v23 }
  0xa3   :  { %203 = vmatmul.f32.vlgmr.msrb.gmra.mxu0 %v118_v25 }
  0xa4   :  { %v137_v26 = vpop.f32.mrf.mxu2 }
  0xa5   :  { %v157_v27 = vpop.f32.mrf.mxu3 }
  0xa6   :  { %v158_v28 = vadd.f32 %v157_v27, %v137_v26 }
  0xa8   :  { %233 = vmatmul.msk.f32.vlgmr.msrb.gmra.mxu1 %vm183_vm0, %v158_v28 }
 0x120   :  { %v204_v30 = vpop.f32.mrf.mxu0 }
 0x121   :  { %v205_v31 = vadd.f32 %v234_v29, %v204_v30 }
 0x125   :  { %v224_v32 = vpop.f32.mrf.mxu1 }
 0x126   :  { %v225_v33 = vadd.f32 %v224_v32, %v205_v31 }
 0x128   :  { %228 = vst.msk [vmem:[%s525_s3] sm:$0xff] %vm227_vm1, %v225_v33 }

</bundles_post_ra>
